<compile_context>
chip_gen: v7x
topology: tpu7x:2x2x1
jax: 0.10.0
libtpu: 0.0.40
codegen_flags: <defaults>
</compile_context>

<pallas_src>
import functools

import jax
import jax.numpy as jnp
from jax.experimental import pallas as pl
from jax.experimental.pallas import tpu as pltpu

MASK_VALUE = -1e30           # finite "minus infinity" for masked logits
LEAKY_SLOPE = 0.2            # GATv2Conv default negative_slope
I_STRIP = 128                # in-kernel sublane strip (rows)
J_STRIP = 128                # in-kernel lane strip (one vreg lane group)


def _round_up(x, m):
    return ((x + m - 1) // m) * m


# ----------------------------------------------------------------------------
# Kernel A: fused GATv2 projections + pre-scaled attention partials
# ----------------------------------------------------------------------------
def _proj_kernel(z_ref, wlr_ref, blr_ref, att06_ref, scale2_ref, absatt04c_ref,
                 slab_ref, xlt_ref, sl_ref, sr_ref):
    xlr = jnp.dot(z_ref[...], wlr_ref[...],
                  preferred_element_type=jnp.float32) + blr_ref[...]      # [T, 2C]
    c = att06_ref.shape[-1]
    xl = xlr[:, :c]                                                       # [T, C]
    xr = xlr[:, c:]                                                       # [T, C]
    att06 = att06_ref[...]                                                # [1, C] = 0.6*att

    # one dense [T, 2C] store:  [x_l | |0.4*att| * x_r]
    slab_ref[...] = xlr * scale2_ref[...]
    xlt = xl.T                                                            # [C, T]
    xlt_ref[...] = xlt * absatt04c_ref[...]                               # |0.4*att[c]| * x_l^T
    sl_ref[...] = jnp.dot(att06, xlt, preferred_element_type=jnp.float32)   # [1, T] (0.6*)
    sr_ref[...] = jnp.dot(xr, att06.T, preferred_element_type=jnp.float32)  # [T, 1] (0.6*)


# ----------------------------------------------------------------------------
# Kernel B: GATv2 attention (strip-wise online softmax) + mean/var heads
# ----------------------------------------------------------------------------
def _gat_attention_kernel(var_eps, signs,
                          blk_ref,                       # SMEM (bi*bj,) int32 occupancy
                          sr_ref, sl_ref, xrs_ref, xlt_ref, xlm_ref, adj_ref,
                          gb_ref, wmv_ref, bmv_ref, noise_ref,
                          out_ref,
                          m_sc, l_sc, acc_sc):
    i = pl.program_id(0)
    j = pl.program_id(1)
    n_ch = len(signs)
    tile_i = adj_ref.shape[0]
    tile_j = adj_ref.shape[1]

    @pl.when(j == 0)
    def _init():
        m_sc[...] = jnp.full_like(m_sc, -jnp.inf)
        l_sc[...] = jnp.zeros_like(l_sc)
        acc_sc[...] = jnp.zeros_like(acc_sc)

    # ---- skip blocks with no edges at all (spatial graphs are very sparse) -----
    @pl.when(blk_ref[i * pl.num_programs(1) + j] != 0)
    def _compute():
        xr_all = xrs_ref[...][:, n_ch:]                  # [TI, C]  |0.4*att|*x_r
        sr_all = sr_ref[...]                             # [TI, 1]  0.6*att.x_r
        for i0 in range(0, tile_i, I_STRIP):
            xr_i = xr_all[i0:i0 + I_STRIP, :]
            sr_i = sr_all[i0:i0 + I_STRIP, :]
            m_i = m_sc[i0:i0 + I_STRIP, :]
            l_i = l_sc[i0:i0 + I_STRIP, :]
            acc_i = acc_sc[i0:i0 + I_STRIP, :]
            for j0 in range(0, tile_j, J_STRIP):
                # 128x128 f32 strip stays register-resident across the channel loop.
                sl_s = sl_ref[:, j0:j0 + J_STRIP]                     # [1, 128]
                xlt_s = xlt_ref[:, j0:j0 + J_STRIP]                   # [C, 128]
                adj_s = adj_ref[i0:i0 + I_STRIP, j0:j0 + J_STRIP]     # [128, 128] int8
                s = sr_i + sl_s                                       # rank-1 linear term
                for ch in range(n_ch):
                    t = jnp.abs(xr_i[:, ch:ch + 1] + xlt_s[ch:ch + 1, :])
                    s = (s + t) if signs[ch] else (s - t)
                s = jnp.where(adj_s != 0, s, MASK_VALUE)
                # Online softmax update.  No explicit re-masking of p: strips that are
                # fully masked before any real edge has raised m contribute exp(0)=1,
                # but are wiped later by corr = exp(MASK_VALUE - m_real) == 0.  Every
                # row is guaranteed a real edge because self-loops are added for all
                # (padded) rows and the diagonal block is never occupancy-skipped.
                m_new = jnp.maximum(m_i, jnp.max(s, axis=-1, keepdims=True))
                corr = jnp.exp(m_i - m_new)
                p = jnp.exp(s - m_new)
                l_i = corr * l_i + jnp.sum(p, axis=-1, keepdims=True)
                xl_s = xlm_ref[j0:j0 + J_STRIP, :][:, :n_ch]          # [128, C] messages
                acc_i = corr * acc_i + jnp.dot(
                    p.astype(jnp.bfloat16), xl_s.astype(jnp.bfloat16),
                    preferred_element_type=jnp.float32)
                m_i = m_new
            m_sc[i0:i0 + I_STRIP, :] = m_i
            l_sc[i0:i0 + I_STRIP, :] = l_i
            acc_sc[i0:i0 + I_STRIP, :] = acc_i

    # ---- finalize: normalize, fused mean/var heads, rsample --------------------
    @pl.when(j == pl.num_programs(1) - 1)
    def _finalize():
        feat = acc_sc[...] / l_sc[...] + gb_ref[...]                          # [TI, C]
        mv = jnp.dot(feat, wmv_ref[...],
                     preferred_element_type=jnp.float32) + bmv_ref[...]       # [TI, 2C]
        mean = mv[:, :n_ch]
        var = jnp.exp(mv[:, n_ch:]) + var_eps
        sample = mean + jnp.sqrt(var) * noise_ref[...]
        out_ref[...] = jnp.concatenate([mean, var, sample], axis=-1)          # [TI, 3C]


# ----------------------------------------------------------------------------
# Wrapper
# ----------------------------------------------------------------------------
def spatial_encoder_forward(z, edge_index, params, noise, var_eps=1e-4):
    """JAX/Pallas equivalent of SpatialEncoder.forward (eval mode)."""
    n_nodes, n_latent = z.shape
    c = params["gat_bias"].shape[-1]
    f32 = jnp.float32

    # Empty-edge early return (matches the PyTorch module).
    if edge_index is None or edge_index.shape[1] == 0:
        zeros = jnp.zeros((n_nodes, c), f32)
        return zeros, jnp.full((n_nodes, c), var_eps, f32), zeros

    # ---- tiling: reduction axis (j) last; tile_j large; i split for 2-TC chips -----
    if n_nodes <= 384:
        n_pad = _round_up(n_nodes, 128)
        tile_i, tile_j = 128, n_pad
    elif n_nodes <= 1024:
        n_pad = _round_up(n_nodes, 256)
        tile_i, tile_j = 256, n_pad
    else:
        n_pad = _round_up(n_nodes, 1024)
        tile_i, tile_j = 256, 1024
    tile_a = tile_j
    bi, bj = n_pad // tile_i, n_pad // tile_j

    # ---- glue (plain JAX): edge trimming + dense int8 adjacency --------------------
    src, dst = edge_index[0], edge_index[1]
    valid = (src >= 0) & (src < n_nodes) & (dst >= 0) & (dst < n_nodes)
    src_c = jnp.where(valid, src, n_pad)        # out-of-range -> dropped by scatter
    dst_c = jnp.where(valid, dst, n_pad)
    adj = jnp.zeros((n_pad, n_pad), jnp.int8)
    adj = adj.at[dst_c, src_c].set(jnp.int8(1), mode="drop")
    diag = jnp.arange(n_pad)
    adj = adj.at[diag, diag].set(jnp.int8(1))   # GATv2Conv add_self_loops=True (all rows)
    # TODO(synk): duplicate edges in edge_index collapse to one entry in the dense mask
    # (PyG would count them multiple times in the softmax).

    # Per-block occupancy (scalar prefetch -> SMEM) for block skipping.
    blk = (jnp.max(adj.reshape(bi, tile_i, bj, tile_j), axis=(1, 3)) > 0)
    blk = blk.astype(jnp.int32).reshape(-1)

    z_pad = jnp.zeros((n_pad, n_latent), f32).at[:n_nodes].set(z.astype(f32))
    noise_pad = jnp.zeros((n_pad, c), f32).at[:n_nodes].set(noise.astype(f32))

    # ---- fused / pre-scaled parameters ---------------------------------------------
    wlr = jnp.concatenate([params["wl"], params["wr"]], axis=1).astype(f32)   # [Dl, 2C]
    blr = jnp.concatenate([params["bl"], params["br"]], axis=1).astype(f32)   # [1, 2C]
    wmv = jnp.concatenate([params["wm"], params["wv"]], axis=1).astype(f32)   # [C, 2C]
    bmv = jnp.concatenate([params["bm"], params["bv"]], axis=1).astype(f32)   # [1, 2C]
    gb = params["gat_bias"].astype(f32)                                       # [1, C]
    att = params["att"].astype(f32)                                           # [1, C]
    lin_coef = (1.0 + LEAKY_SLOPE) / 2.0                                      # 0.6
    abs_coef = (1.0 - LEAKY_SLOPE) / 2.0                                      # 0.4
    att06 = lin_coef * att                                                    # [1, C]
    att04 = abs_coef * att                                                    # [1, C]
    absatt04 = jnp.abs(att04)
    scale2 = jnp.concatenate([jnp.ones((1, c), f32), absatt04], axis=1)       # [1, 2C]
    absatt04c = absatt04.T                                                    # [C, 1]
    # Static sign pattern: sign(0.4*att[c]) chosen at trace time (recompile only if a
    # sign flips).
    # TODO(synk): if params["att"] is a traced jit argument (not a concrete/closure
    # constant), fall back to an in-kernel per-channel scalar multiply from SMEM.
    signs = tuple(bool(v) for v in (jax.device_get(att04)[0] >= 0.0).tolist())

    # ---- kernel A: projections -------------------------------------------------------
    slab, xlt_s, sl06, sr06 = pl.pallas_call(
        _proj_kernel,
        grid=(n_pad // tile_a,),
        in_specs=[
            pl.BlockSpec((tile_a, n_latent), lambda t: (t, 0)),
            pl.BlockSpec((n_latent, 2 * c), lambda t: (0, 0)),
            pl.BlockSpec((1, 2 * c), lambda t: (0, 0)),
            pl.BlockSpec((1, c), lambda t: (0, 0)),            # 0.6*att
            pl.BlockSpec((1, 2 * c), lambda t: (0, 0)),        # [1 | |0.4*att|]
            pl.BlockSpec((c, 1), lambda t: (0, 0)),            # |0.4*att| column
        ],
        out_specs=(
            pl.BlockSpec((tile_a, 2 * c), lambda t: (t, 0)),   # [x_l | scaled x_r]
            pl.BlockSpec((c, tile_a), lambda t: (0, t)),       # scaled x_l^T
            pl.BlockSpec((1, tile_a), lambda t: (0, t)),       # sl (0.6*)
            pl.BlockSpec((tile_a, 1), lambda t: (t, 0)),       # sr (0.6*)
        ),
        out_shape=(
            jax.ShapeDtypeStruct((n_pad, 2 * c), f32),
            jax.ShapeDtypeStruct((c, n_pad), f32),
            jax.ShapeDtypeStruct((1, n_pad), f32),
            jax.ShapeDtypeStruct((n_pad, 1), f32),
        ),
        compiler_params=pltpu.CompilerParams(
            dimension_semantics=("parallel",),
            vmem_limit_bytes=32 * 1024 * 1024),
    )(z_pad, wlr, blr, att06, scale2, absatt04c)

    # ---- kernel B: attention + heads -------------------------------------------------
    out = pl.pallas_call(
        functools.partial(_gat_attention_kernel, float(var_eps), signs),
        grid_spec=pltpu.PrefetchScalarGridSpec(
            num_scalar_prefetch=1,
            grid=(bi, bj),
            in_specs=[
                pl.BlockSpec((tile_i, 1), lambda i, j, blk: (i, 0)),        # sr (0.6*)
                pl.BlockSpec((1, tile_j), lambda i, j, blk: (0, j)),        # sl (0.6*)
                pl.BlockSpec((tile_i, 2 * c), lambda i, j, blk: (i, 0)),    # slab (x_r' cols)
                pl.BlockSpec((c, tile_j), lambda i, j, blk: (0, j)),        # x_l'^T
                pl.BlockSpec((tile_j, 2 * c), lambda i, j, blk: (j, 0)),    # slab (x_l msgs)
                pl.BlockSpec((tile_i, tile_j), lambda i, j, blk: (i, j)),   # adj (int8)
                pl.BlockSpec((1, c), lambda i, j, blk: (0, 0)),             # gat bias
                pl.BlockSpec((c, 2 * c), lambda i, j, blk: (0, 0)),         # [Wm | Wv]
                pl.BlockSpec((1, 2 * c), lambda i, j, blk: (0, 0)),         # [bm | bv]
                pl.BlockSpec((tile_i, c), lambda i, j, blk: (i, 0)),        # noise
            ],
            out_specs=pl.BlockSpec((tile_i, 3 * c), lambda i, j, blk: (i, 0)),
            scratch_shapes=[
                pltpu.VMEM((tile_i, 1), f32),      # running max m
                pltpu.VMEM((tile_i, 1), f32),      # running sum l
                pltpu.VMEM((tile_i, c), f32),      # weighted-message accumulator
            ],
        ),
        out_shape=jax.ShapeDtypeStruct((n_pad, 3 * c), f32),
        compiler_params=pltpu.CompilerParams(
            dimension_semantics=("parallel", "arbitrary"),
            vmem_limit_bytes=32 * 1024 * 1024),
    )(blk, sr06, sl06, slab, xlt_s, slab, adj, gb, wmv, bmv, noise_pad)

    out = out[:n_nodes]
    mean, var, sample = out[:, :c], out[:, c:2 * c], out[:, 2 * c:]

    # If every edge was trimmed, the module returns zeros / var_eps / zeros.
    has_edges = jnp.sum(valid) > 0
    mean = jnp.where(has_edges, mean, 0.0)
    var = jnp.where(has_edges, var, var_eps)
    sample = jnp.where(has_edges, sample, 0.0)
    return mean, var, sample


# ----------------------------------------------------------------------------
# Pure-JAX reference (dense GATv2 + heads) for validation
# ----------------------------------------------------------------------------
def _reference_forward(z, adj_mask, params, noise, var_eps):
    xl = z @ params["wl"] + params["bl"]
    xr = z @ params["wr"] + params["br"]
    pair = xl[None, :, :] + xr[:, None, :]
    pair = jnp.where(pair >= 0, pair, LEAKY_SLOPE * pair)
    scores = jnp.sum(pair * params["att"][None, :, :], axis=-1)
    scores = jnp.where(adj_mask, scores, -jnp.inf)
    alpha = jax.nn.softmax(scores, axis=-1)
    feat = alpha @ xl + params["gat_bias"]
    mean = feat @ params["wm"] + params["bm"]
    var = jnp.exp(feat @ params["wv"] + params["bv"]) + var_eps
    sample = mean + jnp.sqrt(var) * noise
    return mean, var, sample


def init_params(key, n_latent, n_spatial):
    """Deterministic synthetic parameters (weights stored as [in, out])."""
    ks = jax.random.split(key, 12)
    f32 = jnp.float32
    s = 0.1
    return {
        "wl": jax.random.normal(ks[0], (n_latent, n_spatial), f32) * s,
        "bl": jax.random.normal(ks[1], (1, n_spatial), f32) * 0.05,
        "wr": jax.random.normal(ks[2], (n_latent, n_spatial), f32) * s,
        "br": jax.random.normal(ks[3], (1, n_spatial), f32) * 0.05,
        "att": jax.random.normal(ks[4], (1, n_spatial), f32) * s,
        "gat_bias": jax.random.normal(ks[5], (1, n_spatial), f32) * 0.05,
        "wm": jax.random.normal(ks[6], (n_spatial, n_spatial), f32) * s,
        "bm": jax.random.normal(ks[7], (1, n_spatial), f32) * 0.05,
        "wv": jax.random.normal(ks[8], (n_spatial, n_spatial), f32) * s,
        "bv": jax.random.normal(ks[9], (1, n_spatial), f32) * 0.05,
    }


if __name__ == "__main__":
    n_nodes, n_latent, n_spatial = 16, 32, 16

    key = jax.random.PRNGKey(0)
    k_z, k_p, k_n = jax.random.split(key, 3)

    z = jax.random.normal(k_z, (n_nodes, n_latent), jnp.float32)
    params = init_params(k_p, n_latent, n_spatial)
    noise = jax.random.normal(k_n, (n_nodes, n_spatial), jnp.float32)

    # Bidirectional ring graph: edge_index[0] = sources, edge_index[1] = targets.
    idx = jnp.arange(n_nodes)
    nxt = (idx + 1) % n_nodes
    edge_index = jnp.stack([jnp.concatenate([idx, nxt]),
                            jnp.concatenate([nxt, idx])]).astype(jnp.int32)

    spatial_mean, spatial_var, spatial_sample = spatial_encoder_forward(
        z, edge_index, params, noise, var_eps=1e-4)
    jax.block_until_ready((spatial_mean, spatial_var, spatial_sample))

    assert spatial_mean.shape == (n_nodes, n_spatial)
    assert spatial_var.shape == (n_nodes, n_spatial)
    assert spatial_sample.shape == (n_nodes, n_spatial)
    assert bool(jnp.all(spatial_var > 0))
    assert bool(jnp.all(jnp.isfinite(spatial_sample)))

    # Validate against a dense pure-JAX reference.
    adj_mask = jnp.zeros((n_nodes, n_nodes), bool)
    adj_mask = adj_mask.at[edge_index[1], edge_index[0]].set(True)
    adj_mask = adj_mask.at[idx, idx].set(True)
    ref_mean, ref_var, ref_sample = _reference_forward(
        z, adj_mask, params, noise, 1e-4)
    assert bool(jnp.allclose(spatial_mean, ref_mean, rtol=2e-2, atol=2e-2))
    assert bool(jnp.allclose(spatial_var, ref_var, rtol=2e-2, atol=2e-2))
    assert bool(jnp.allclose(spatial_sample, ref_sample, rtol=2e-2, atol=2e-2))

    print("KERNEL_OK")
</pallas_src>

<mosaic_0001>
module attributes {stable_mosaic.version = 11 : i64} {
  func.func @_proj_kernel(%arg0: i32, %arg1: memref<128x32xf32, #tpu.memory_space<vmem>>, %arg2: memref<32x32xf32, #tpu.memory_space<vmem>>, %arg3: memref<1x32xf32, #tpu.memory_space<vmem>>, %arg4: memref<1x16xf32, #tpu.memory_space<vmem>>, %arg5: memref<1x32xf32, #tpu.memory_space<vmem>>, %arg6: memref<16x1xf32, #tpu.memory_space<vmem>>, %arg7: memref<128x32xf32, #tpu.memory_space<vmem>>, %arg8: memref<16x128xf32, #tpu.memory_space<vmem>>, %arg9: memref<1x128xf32, #tpu.memory_space<vmem>>, %arg10: memref<128x1xf32, #tpu.memory_space<vmem>>) attributes {dimension_semantics = [#tpu.dimension_semantics<parallel>], iteration_bounds = array<i64: 1>, scalar_prefetch = 0 : i64, scratch_operands = 0 : i64, tpu.core_type = #tpu.core_type<tc>, window_params = [{transform_indices = @transform_0, window_bounds = array<i64: 128, 32>}, {pipeline_mode = #tpu.pipeline_mode<synchronous>, transform_indices = @transform_1, window_bounds = array<i64: 32, 32>}, {pipeline_mode = #tpu.pipeline_mode<synchronous>, transform_indices = @transform_2, window_bounds = array<i64: 1, 32>}, {pipeline_mode = #tpu.pipeline_mode<synchronous>, transform_indices = @transform_3, window_bounds = array<i64: 1, 16>}, {pipeline_mode = #tpu.pipeline_mode<synchronous>, transform_indices = @transform_4, window_bounds = array<i64: 1, 32>}, {pipeline_mode = #tpu.pipeline_mode<synchronous>, transform_indices = @transform_5, window_bounds = array<i64: 16, 1>}, {transform_indices = @transform_6, window_bounds = array<i64: 128, 32>}, {transform_indices = @transform_7, window_bounds = array<i64: 16, 128>}, {transform_indices = @transform_8, window_bounds = array<i64: 1, 128>}, {transform_indices = @transform_9, window_bounds = array<i64: 128, 1>}]} {
    %c0 = arith.constant 0 : index
    %c0_0 = arith.constant 0 : index
    %0 = vector.load %arg1[%c0, %c0_0] : memref<128x32xf32, #tpu.memory_space<vmem>>, vector<128x32xf32>
    %c0_1 = arith.constant 0 : index
    %c0_2 = arith.constant 0 : index
    %1 = vector.load %arg2[%c0_1, %c0_2] : memref<32x32xf32, #tpu.memory_space<vmem>>, vector<32x32xf32>
    %cst = arith.constant dense<0.000000e+00> : vector<128x32xf32>
    %2 = tpu.matmul %0, %1, %cst {dimension_numbers = #tpu.dot_dimension_numbers<[1], [0], [0], [1], [0, 0, 1, 1], [], []>} : vector<128x32xf32>, vector<32x32xf32>, vector<128x32xf32> -> vector<128x32xf32>
    %c0_3 = arith.constant 0 : index
    %c0_4 = arith.constant 0 : index
    %3 = vector.load %arg3[%c0_3, %c0_4] : memref<1x32xf32, #tpu.memory_space<vmem>>, vector<1x32xf32>
    %4 = vector.broadcast %3 : vector<1x32xf32> to vector<128x32xf32>
    %5 = arith.addf %2, %4 : vector<128x32xf32>
    %6 = vector.extract_strided_slice %5 {offsets = [0, 0], sizes = [128, 16], strides = [1, 1]} : vector<128x32xf32> to vector<128x16xf32>
    %7 = vector.extract_strided_slice %5 {offsets = [0, 16], sizes = [128, 16], strides = [1, 1]} : vector<128x32xf32> to vector<128x16xf32>
    %c0_5 = arith.constant 0 : index
    %c0_6 = arith.constant 0 : index
    %8 = vector.load %arg4[%c0_5, %c0_6] : memref<1x16xf32, #tpu.memory_space<vmem>>, vector<1x16xf32>
    %c0_7 = arith.constant 0 : index
    %c0_8 = arith.constant 0 : index
    %9 = vector.load %arg5[%c0_7, %c0_8] : memref<1x32xf32, #tpu.memory_space<vmem>>, vector<1x32xf32>
    %10 = vector.broadcast %9 : vector<1x32xf32> to vector<128x32xf32>
    %11 = arith.mulf %5, %10 : vector<128x32xf32>
    %c0_9 = arith.constant 0 : index
    %c0_10 = arith.constant 0 : index
    %12 = vector.load %arg7[%c0_9, %c0_10] : memref<128x32xf32, #tpu.memory_space<vmem>>, vector<128x32xf32>
    tpu.vector_store %arg7[%c0_9, %c0_10], %11 {strides = array<i32>} : memref<128x32xf32, #tpu.memory_space<vmem>>, vector<128x32xf32>,
    %13 = tpu.transpose %6, [1, 0] : vector<128x16xf32> -> vector<16x128xf32>
    %c0_11 = arith.constant 0 : index
    %c0_12 = arith.constant 0 : index
    %14 = vector.load %arg6[%c0_11, %c0_12] : memref<16x1xf32, #tpu.memory_space<vmem>>, vector<16x1xf32>
    %15 = vector.broadcast %14 : vector<16x1xf32> to vector<16x128xf32>
    %16 = arith.mulf %13, %15 : vector<16x128xf32>
    %c0_13 = arith.constant 0 : index
    %c0_14 = arith.constant 0 : index
    %17 = vector.load %arg8[%c0_13, %c0_14] : memref<16x128xf32, #tpu.memory_space<vmem>>, vector<16x128xf32>
    tpu.vector_store %arg8[%c0_13, %c0_14], %16 {strides = array<i32>} : memref<16x128xf32, #tpu.memory_space<vmem>>, vector<16x128xf32>,
    %cst_15 = arith.constant dense<0.000000e+00> : vector<1x128xf32>
    %18 = tpu.matmul %8, %13, %cst_15 {dimension_numbers = #tpu.dot_dimension_numbers<[1], [0], [0], [1], [0, 0, 1, 1], [], []>} : vector<1x16xf32>, vector<16x128xf32>, vector<1x128xf32> -> vector<1x128xf32>
    %c0_16 = arith.constant 0 : index
    %c0_17 = arith.constant 0 : index
    %19 = vector.load %arg9[%c0_16, %c0_17] : memref<1x128xf32, #tpu.memory_space<vmem>>, vector<1x128xf32>
    tpu.vector_store %arg9[%c0_16, %c0_17], %18 {strides = array<i32>} : memref<1x128xf32, #tpu.memory_space<vmem>>, vector<1x128xf32>,
    %20 = tpu.transpose %8, [1, 0] : vector<1x16xf32> -> vector<16x1xf32>
    %cst_18 = arith.constant dense<0.000000e+00> : vector<128x1xf32>
    %21 = tpu.matmul %7, %20, %cst_18 {dimension_numbers = #tpu.dot_dimension_numbers<[1], [0], [0], [1], [0, 0, 1, 1], [], []>} : vector<128x16xf32>, vector<16x1xf32>, vector<128x1xf32> -> vector<128x1xf32>
    %c0_19 = arith.constant 0 : index
    %c0_20 = arith.constant 0 : index
    %22 = vector.load %arg10[%c0_19, %c0_20] : memref<128x1xf32, #tpu.memory_space<vmem>>, vector<128x1xf32>
    tpu.vector_store %arg10[%c0_19, %c0_20], %21 {strides = array<i32>} : memref<128x1xf32, #tpu.memory_space<vmem>>, vector<128x1xf32>,
    return
  }
  func.func @transform_0(%arg0: i32) -> (i32, i32) {
    %c0_i32 = arith.constant 0 : i32
    %c0_i32_0 = arith.constant 0 : i32
    return %arg0, %c0_i32 : i32, i32
  }
  func.func @transform_1(%arg0: i32) -> (i32, i32) {
    %c0_i32 = arith.constant 0 : i32
    %c0_i32_0 = arith.constant 0 : i32
    %c0_i32_1 = arith.constant 0 : i32
    return %c0_i32, %c0_i32_0 : i32, i32
  }
  func.func @transform_2(%arg0: i32) -> (i32, i32) {
    %c0_i32 = arith.constant 0 : i32
    %c0_i32_0 = arith.constant 0 : i32
    %c0_i32_1 = arith.constant 0 : i32
    return %c0_i32, %c0_i32_0 : i32, i32
  }
  func.func @transform_3(%arg0: i32) -> (i32, i32) {
    %c0_i32 = arith.constant 0 : i32
    %c0_i32_0 = arith.constant 0 : i32
    %c0_i32_1 = arith.constant 0 : i32
    return %c0_i32, %c0_i32_0 : i32, i32
  }
  func.func @transform_4(%arg0: i32) -> (i32, i32) {
    %c0_i32 = arith.constant 0 : i32
    %c0_i32_0 = arith.constant 0 : i32
    %c0_i32_1 = arith.constant 0 : i32
    return %c0_i32, %c0_i32_0 : i32, i32
  }
  func.func @transform_5(%arg0: i32) -> (i32, i32) {
    %c0_i32 = arith.constant 0 : i32
    %c0_i32_0 = arith.constant 0 : i32
    %c0_i32_1 = arith.constant 0 : i32
    return %c0_i32, %c0_i32_0 : i32, i32
  }
  func.func @transform_6(%arg0: i32) -> (i32, i32) {
    %c0_i32 = arith.constant 0 : i32
    %c0_i32_0 = arith.constant 0 : i32
    return %arg0, %c0_i32 : i32, i32
  }
  func.func @transform_7(%arg0: i32) -> (i32, i32) {
    %c0_i32 = arith.constant 0 : i32
    %c0_i32_0 = arith.constant 0 : i32
    return %c0_i32, %arg0 : i32, i32
  }
  func.func @transform_8(%arg0: i32) -> (i32, i32) {
    %c0_i32 = arith.constant 0 : i32
    %c0_i32_0 = arith.constant 0 : i32
    return %c0_i32, %arg0 : i32, i32
  }
  func.func @transform_9(%arg0: i32) -> (i32, i32) {
    %c0_i32 = arith.constant 0 : i32
    %c0_i32_0 = arith.constant 0 : i32
    return %arg0, %c0_i32 : i32, i32
  }
}

</mosaic_0001>

<bundles_post_ra>
// kernel: tpu_custom_call.1
= control target key start
LH: loop header
LB: loop body
LE: loop exit
PB: predicated region body
PF: predicated region fallthrough
CT: control target
= control target key end

     0   :  { %15 = vsyncpa [#allocation3], 0  ;;  %vm56_vm0 = vcmask 261120   ;;  %v413_v3 = vlaneseq  ;;  %s1191_s0 = inlined_call_operand.vmem [shape: f32[128,32], index: 0, kind: input, shape index: {}]   ;;  %s1192_s1 = inlined_call_operand.vmem [shape: f32[32,32], index: 1, kind: input, shape index: {}]   ;;  %s1193_s2 = inlined_call_operand.vmem [shape: f32[1,32], index: 2, kind: input, shape index: {}]   ;;  %s1194_s3 = inlined_call_operand.vmem [shape: f32[1,16], index: 3, kind: input, shape index: {}]   ;;  %s1195_s4 = inlined_call_operand.vmem [shape: f32[1,32], index: 4, kind: input, shape index: {}]   ;;  %s1196_s5 = inlined_call_operand.vmem [shape: f32[16,1], index: 5, kind: input, shape index: {}]   ;;  %s1197_s6 = inlined_call_operand.vmem [shape: f32[128,32], index: 6, kind: output, shape index: {0}]   ;;  %s1198_s7 = inlined_call_operand.hbm [shape: f32[16,128], index: 7, kind: output, shape index: {1}]   ;;  %s1199_s8 = inlined_call_operand.hbm [shape: f32[1,128], index: 8, kind: output, shape index: {2}]   ;;  %s1200_s9 = inlined_call_operand.vmem [shape: f32[128,1], index: 9, kind: output, shape index: {3}]  }
   0x1   :  { %v45_v0 = vld [vmem:[%s1192_s1] sm:$0xff]  ;;  %v46_v1 = vld [vmem:[%s1192_s1 + $0x8] sm:$0xff]  ;;  %v47_v2 = vld [vmem:[%s1192_s1 + $0x10] sm:$0xff] }
   0x2   :  { %v684_v4 = vpack.c.bf16 %v46_v1, %v45_v0  ;;  %v48_v5 = vld [vmem:[%s1192_s1 + $0x18] sm:$0xff]  ;;  %v29_v6 = vld [vmem:[%s1191_s0] sm:$0xff]  ;;  %v414_v8 = vshrl.u32 %v413_v3, 7  ;;  %v39_v9 = vld [vmem:[%s1191_s0 + $0x50] sm:$0xff] }
   0x3   :  { %v688_v7 = vpack.c.bf16 %v48_v5, %v47_v2  ;;  %653 = vmatprep.mubr.msk.f32.mxu0 %vm56_vm0, %v29_v6  ;;  %668 = vmatprep.mubr.msk.f32.mxu1 %vm56_vm0, %v39_v9  ;;  %v842_v11 = vld [vmem:[%s1194_s3] sm:$0x1] }
   0x4   :  { %685 = vmatprep.subr.bf16.mxu0 %v684_v4  ;;  %695 = vmatprep.subr.bf16.mxu1 %v684_v4  ;;  %v415_v10 = vsub.s32 0, %v414_v8 }
   0x5   :  { %687 = vmatpush3.bf16.msra.mxu0 %v684_v4  ;;  %697 = vmatpush3.bf16.msra.mxu1 %v684_v4 }
   0x6   :  { %689 = vmatprep.subr.bf16.mxu0 %v688_v7  ;;  %696 = vmatprep.subr.bf16.mxu1 %v688_v7  ;;  %v416_v12 = vrot.slane %v842_v11, %v415_v10 }
   0x7   :  { %16 = vsyncpa [#allocation5], 0  ;;  %v30_v13 = vld [vmem:[%s1191_s0 + $0x8] sm:$0xff]  ;;  %v40_v14 = vld [vmem:[%s1191_s0 + $0x58] sm:$0xff]  ;;  %s759_s29 = smov 16   ;;  %s760_s13 = smov 112  }
   0x8   :  { %v31_v15 = vld [vmem:[%s1191_s0 + $0x10] sm:$0xff]  ;;  %v41_v16 = vld [vmem:[%s1191_s0 + $0x60] sm:$0xff]  ;;  %417 = vrot.lane.b32.xlu1 %v416_v12, %s759_s29  ;;  %v32_v17 = vld [vmem:[%s1191_s0 + $0x18] sm:$0xff]  ;;  %v761_v9 = vmov 0.0|0.0   ;;  %vm762_vm1 = vmmov 0   ;;  %vm338_vm2 = vcmask 130048  }
   0x9   :  { %691 = vmatpush3.bf16.msra.mxu0 %v688_v7  ;;  %698 = vmatpush3.bf16.msra.mxu1 %v688_v7  ;;  %v42_v18 = vld [vmem:[%s1191_s0 + $0x68] sm:$0xff]  ;;  %v33_v19 = vld [vmem:[%s1191_s0 + $0x20] sm:$0xff]  ;;  %v43_v20 = vld [vmem:[%s1191_s0 + $0x70] sm:$0xff]  ;;  %vm548_vm3 = vcmask 7168   ;;  %s765_s19 = smov [#allocation4]  }
   0xa   :  { %v34_v21 = vld [vmem:[%s1191_s0 + $0x28] sm:$0xff]  ;;  %v44_v22 = vld [vmem:[%s1191_s0 + $0x78] sm:$0xff]  ;;  %v35_v23 = vld [vmem:[%s1191_s0 + $0x30] sm:$0xff]  ;;  %692 = vmatprep.subr.bf16.mxu1 %v761_v9  ;;  %s585_s20 = sshll.u32 %s765_s19, 4  ;;  %s586_s20 = int_to_ptr.vmem [resolvable:$true] %s585_s20 }
   0xb   :  { %v36_v24 = vld [vmem:[%s1191_s0 + $0x38] sm:$0xff]  ;;  %v37_v25 = vld [vmem:[%s1191_s0 + $0x40] sm:$0xff]  ;;  %v38_v26 = vld [vmem:[%s1191_s0 + $0x48] sm:$0xff]  ;;  %s711_s1 = scalar_lea.vmem %s586_s20, 16  ;;  %s715_s21 = scalar_lea.vmem %s586_s20, 32 }
   0xc   :  { %654 = vmatmul.mubr.msk.f32.vlgmr.msra.gmra.mrb[0].mxu0 %vm56_vm0, %v30_v13  ;;  %669 = vmatmul.mubr.msk.f32.vlgmr.msra.gmra.mrb[0].mxu1 %vm56_vm0, %v40_v14  ;;  %v904_v27 = vld [vmem:[%s1193_s2] ss:$0 sm:$0xff]  ;;  %p712_p0 = scmp.ne.s32.totalorder %s586_s20, %s711_s1  ;;  %p716_p1 = scmp.lt.s32.totalorder %s586_s20, %s586_s20 }
   0xd   :  { %656 = vmatprep.mubr.msk.f32.mxu0 %vm56_vm0, %v31_v15  ;;  %671 = vmatprep.mubr.msk.f32.mxu1 %vm56_vm0, %v41_v16  ;;  %v911_v30 = vld [vmem:[%s1195_s4] ss:$0 sm:$0xff]  ;;  %p717_p2 = scmp.lt.s32.totalorder %s715_s21, %s711_s1 }
   0xf   :  { %p718_p3 = por %p717_p2, %p716_p1 }
  0x10   :  { %657 = vmatmul.mubr.msk.f32.gmra.mrb[2].mxu0 %vm56_vm0, %v32_v17  ;;  %672 = vmatmul.mubr.msk.f32.gmra.mrb[2].mxu1 %vm56_vm0, %v42_v18 }
  0x11   :  { %659 = vmatprep.mubr.msk.f32.mxu0 %vm56_vm0, %v33_v19  ;;  %674 = vmatprep.mubr.msk.f32.mxu1 %vm56_vm0, %v43_v20  ;;  %p719_p4 = pnand %p718_p3, %p712_p0 }
  0x14   :  { %660 = vmatmul.mubr.msk.f32.gmra.mrb[4].mxu0 %vm56_vm0, %v34_v21  ;;  %675 = vmatmul.mubr.msk.f32.gmra.mrb[4].mxu1 %vm56_vm0, %v44_v22 }
  0x15   :  { %662 = vmatprep.mubr.msk.f32.mxu0 %vm56_vm0, %v35_v23  ;;  %v763_v23 = vmov 0.0  }
  0x16   :  { %681 = vmatprep.mubr.msk.f32.mxu1 %vm762_vm1, %v763_v23 }
  0x18   :  { %663 = vmatmul.mubr.msk.f32.gmra.mrb[6].mxu0 %vm56_vm0, %v36_v24 }
  0x19   :  { %665 = vmatprep.mubr.msk.f32.mxu0 %vm56_vm0, %v37_v25 }
  0x1c   :  { %666 = vmatmul.mubr.msk.f32.gmra.mrb[8].mxu0 %vm56_vm0, %v38_v26 }
  0x7a   :  { %v906_v28 = vpop.permute.xlu1 %417 }
  0xdf   :  { %v655_v29 = vpop.f32.mrb[0].mxu0  ;;  %v670_v31 = vpop.f32.mrb[0].mxu1 }
  0xe0   :  { %v177_v32 = vadd.f32 %v655_v29, %v904_v27  ;;  %v171_v33 = vpop.f32.mrb[1].mxu0  ;;  %v915_v34 = vadd.f32 %v670_v31, %v904_v27  ;;  %v221_v35 = vpop.f32.mrb[1].mxu1 }
  0xe1   :  { %v172_v36 = vadd.f32 %v904_v27, %v171_v33  ;;  %v919_v37 = vadd.f32 %v904_v27, %v221_v35  ;;  %v764_v33 = vmov 0  }
  0xe2   :  { %v259_v38 = vmul.f32 %v911_v30, %v177_v32  ;;  %v269_v39 = vmul.f32 %v911_v30, %v915_v34  ;;  %v421_v54 = vmul.f32 %v906_v28, %v177_v32  ;;  %v431_v29 = vmul.f32 %v906_v28, %v915_v34  ;;  %709 = vset.pattern.permute.xlu1 %v764_v33 }
  0xe3   :  { %v258_v40 = vmul.f32 %v911_v30, %v172_v36  ;;  %290 = vxpose.xlu0.b32.start [1/16] (narrow) %v172_v36, 16  ;;  %v420_v41 = vmul.f32 %v906_v28, %v172_v36  ;;  %v658_v42 = vpop.f32.mrb[2].mxu0  ;;  %v268_v43 = vmul.f32 %v911_v30, %v919_v37  ;;  %v673_v44 = vpop.f32.mrb[2].mxu1 }
  0xe4   :  { %275 = vst.msk [vmem:[%s1197_s6 + $0x8] sm:$0xff] %vm56_vm0, %v259_v38  ;;  %v187_v45 = vadd.f32 %v658_v42, %v904_v27  ;;  %v181_v46 = vpop.f32.mrb[3].mxu0  ;;  %285 = vst.msk [vmem:[%s1197_s6 + $0x58] sm:$0xff] %vm56_vm0, %v269_v39  ;;  %v938_v47 = vadd.f32 %v673_v44, %v904_v27  ;;  %v231_v48 = vpop.f32.mrb[3].mxu1 }
  0xe5   :  { %274 = vst.msk [vmem:[%s1197_s6] sm:$0xff] %vm56_vm0, %v258_v40  ;;  %452 = vrot.lane.b32.xlu1 %v420_v41, %s760_s13  ;;  %v182_v49 = vadd.f32 %v904_v27, %v181_v46  ;;  %284 = vst.msk [vmem:[%s1197_s6 + $0x50] sm:$0xff] %vm56_vm0, %v268_v43  ;;  %v951_v50 = vadd.f32 %v904_v27, %v231_v48 }
  0xe6   :  { %v261_v51 = vmul.f32 %v911_v30, %v187_v45  ;;  %v271_v52 = vmul.f32 %v911_v30, %v938_v47  ;;  %v423_v12 = vmul.f32 %v906_v28, %v187_v45  ;;  %v433_v31 = vmul.f32 %v906_v28, %v938_v47 }
  0xe7   :  { %v260_v53 = vmul.f32 %v911_v30, %v182_v49  ;;  %291 = vxpose.xlu0.b32.cont [2/16] (narrow) %v177_v32, 16  ;;  %v661_v55 = vpop.f32.mrb[4].mxu0  ;;  %v270_v56 = vmul.f32 %v911_v30, %v951_v50  ;;  %v676_v57 = vpop.f32.mrb[4].mxu1  ;;  %v422_v62 = vmul.f32 %v906_v28, %v182_v49 }
  0xe8   :  { %277 = vst.msk [vmem:[%s1197_s6 + $0x18] sm:$0xff] %vm56_vm0, %v261_v51  ;;  %v197_v58 = vadd.f32 %v661_v55, %v904_v27  ;;  %v191_v59 = vpop.f32.mrb[5].mxu0  ;;  %287 = vst.msk [vmem:[%s1197_s6 + $0x68] sm:$0xff] %vm56_vm0, %v271_v52  ;;  %v970_v60 = vadd.f32 %v676_v57, %v904_v27  ;;  %v241_v61 = vpop.f32.mrb[5].mxu1 }
  0xe9   :  { %276 = vst.msk [vmem:[%s1197_s6 + $0x10] sm:$0xff] %vm56_vm0, %v260_v53  ;;  %454 = vrot.lane.b32.xlu1 %v421_v54, %s760_s13  ;;  %v192_v63 = vadd.f32 %v904_v27, %v191_v59  ;;  %286 = vst.msk [vmem:[%s1197_s6 + $0x60] sm:$0xff] %vm56_vm0, %v270_v56  ;;  %v984_v0 = vadd.f32 %v904_v27, %v241_v61 }
  0xea   :  { %v263_v1 = vmul.f32 %v911_v30, %v197_v58  ;;  %v273_v2 = vmul.f32 %v911_v30, %v970_v60  ;;  %v425_v21 = vmul.f32 %v906_v28, %v197_v58 }
  0xeb   :  { %292 = vxpose.xlu0.b32.cont [3/16] (narrow) %v182_v49, 16  ;;  %v262_v3 = vmul.f32 %v911_v30, %v192_v63  ;;  %v664_v4 = vpop.f32.mrb[6].mxu0  ;;  %v272_v5 = vmul.f32 %v911_v30, %v984_v0  ;;  %v424_v17 = vmul.f32 %v906_v28, %v192_v63  ;;  %v434_v32 = vmul.f32 %v906_v28, %v984_v0 }
  0xec   :  { %279 = vst.msk [vmem:[%s1197_s6 + $0x28] sm:$0xff] %vm56_vm0, %v263_v1  ;;  %v207_v6 = vadd.f32 %v664_v4, %v904_v27  ;;  %v201_v7 = vpop.f32.mrb[7].mxu0  ;;  %289 = vst.msk [vmem:[%s1197_s6 + $0x78] sm:$0xff] %vm56_vm0, %v273_v2  ;;  %v322_v2 = vld [vmem:[%s1196_s5] sm:$0xff] }
  0xed   :  { %456 = vrot.lane.b32.xlu1 %v422_v62, %s760_s13  ;;  %278 = vst.msk [vmem:[%s1197_s6 + $0x20] sm:$0xff] %vm56_vm0, %v262_v3  ;;  %v202_v8 = vadd.f32 %v904_v27, %v201_v7  ;;  %288 = vst.msk [vmem:[%s1197_s6 + $0x70] sm:$0xff] %vm56_vm0, %v272_v5  ;;  %v323_v5 = vld [vmem:[%s1196_s5 + $0x8] sm:$0xff] }
  0xee   :  { %v265_v10 = vmul.f32 %v911_v30, %v207_v6  ;;  %v427_v24 = vmul.f32 %v906_v28, %v207_v6 }
  0xef   :  { %293 = vxpose.xlu0.b32.cont [4/16] (narrow) %v187_v45, 16  ;;  %v264_v13 = vmul.f32 %v911_v30, %v202_v8  ;;  %v667_v14 = vpop.f32.mrb[8].mxu0  ;;  %v426_v22 = vmul.f32 %v906_v28, %v202_v8 }
  0xf0   :  { %281 = vst.msk [vmem:[%s1197_s6 + $0x38] sm:$0xff] %vm56_vm0, %v265_v10  ;;  %v217_v15 = vadd.f32 %v667_v14, %v904_v27  ;;  %v211_v16 = vpop.f32.mrb[9].mxu0 }
  0xf1   :  { %458 = vrot.lane.b32.xlu1 %v423_v12, %s760_s13  ;;  %280 = vst.msk [vmem:[%s1197_s6 + $0x30] sm:$0xff] %vm56_vm0, %v264_v13  ;;  %v212_v18 = vadd.f32 %v904_v27, %v211_v16  ;;  %v430_v27 = vmul.f32 %v906_v28, %v919_v37 }
  0xf2   :  { %v267_v19 = vmul.f32 %v911_v30, %v217_v15  ;;  %v429_v26 = vmul.f32 %v906_v28, %v217_v15 }
  0xf3   :  { %294 = vxpose.xlu0.b32.cont [5/16] (narrow) %v192_v63, 16  ;;  %v266_v20 = vmul.f32 %v911_v30, %v212_v18  ;;  %v428_v25 = vmul.f32 %v906_v28, %v212_v18  ;;  %v432_v30 = vmul.f32 %v906_v28, %v951_v50 }
  0xf4   :  { %283 = vst.msk [vmem:[%s1197_s6 + $0x48] sm:$0xff] %vm56_vm0, %v267_v19 }
  0xf5   :  { %460 = vrot.lane.b32.xlu1 %v424_v17, %s760_s13  ;;  %282 = vst.msk [vmem:[%s1197_s6 + $0x40] sm:$0xff] %vm56_vm0, %v266_v20 }
  0xf7   :  { %295 = vxpose.xlu0.b32.cont [6/16] (narrow) %v197_v58, 16 }
  0xf9   :  { %462 = vrot.lane.b32.xlu1 %v425_v21, %s760_s13 }
  0xfb   :  { %296 = vxpose.xlu0.b32.cont [7/16] (narrow) %v202_v8, 16 }
  0xfd   :  { %464 = vrot.lane.b32.xlu1 %v426_v22, %s760_s13 }
  0xff   :  { %297 = vxpose.xlu0.b32.cont [8/16] (narrow) %v207_v6, 16 }
 0x101   :  { %466 = vrot.lane.b32.xlu1 %v427_v24, %s760_s13 }
 0x103   :  { %298 = vxpose.xlu0.b32.cont [9/16] (narrow) %v212_v18, 16 }
 0x105   :  { %468 = vrot.lane.b32.xlu1 %v428_v25, %s760_s13 }
 0x107   :  { %299 = vxpose.xlu0.b32.cont [10/16] (narrow) %v217_v15, 16 }
 0x109   :  { %470 = vrot.lane.b32.xlu1 %v429_v26, %s760_s13 }
 0x10b   :  { %300 = vxpose.xlu0.b32.cont [11/16] (narrow) %v919_v37, 16 }
 0x10d   :  { %472 = vrot.lane.b32.xlu1 %v430_v27, %s760_s13 }
 0x10f   :  { %301 = vxpose.xlu0.b32.cont [12/16] (narrow) %v915_v34, 16  ;;  %v435_v34 = vmul.f32 %v906_v28, %v970_v60 }
 0x111   :  { %474 = vrot.lane.b32.xlu1 %v431_v29, %s760_s13 }
 0x113   :  { %302 = vxpose.xlu0.b32.cont [13/16] (narrow) %v951_v50, 16 }
 0x115   :  { %476 = vrot.lane.b32.xlu1 %v432_v30, %s760_s13 }
 0x117   :  { %303 = vxpose.xlu0.b32.cont [14/16] (narrow) %v938_v47, 16 }
 0x119   :  { %478 = vrot.lane.b32.xlu1 %v433_v31, %s760_s13 }
 0x11b   :  { %304 = vxpose.xlu0.b32.cont [15/16] (narrow) %v984_v0, 16 }
 0x11d   :  { %480 = vrot.lane.b32.xlu1 %v434_v32, %s760_s13 }
 0x11f   :  { %305 = vxpose.xlu0.b32.end [16/16] (narrow) %v970_v60, 16 }
 0x148   :  { %482 = vrot.lane.b32.xlu0 %v435_v34, %s760_s13 }
 0x149   :  { %710 = vset.pattern.permute.xlu0 %v764_v33 }
 0x157   :  { %v453_v35 = vpop.permute.xlu1 %452 }
 0x158   :  { %v500_v39 = vsel %vm338_vm2, %v453_v35, 0.0 }
 0x15b   :  { %v455_v36 = vpop.permute.xlu1 %454 }
 0x15c   :  { %v503_v37 = vsel %vm338_vm2, %v455_v36, 0.0 }
 0x15d   :  { %504 = vadd.xlane.f32.xlu1 %v503_v37 }
 0x15f   :  { %v457_v38 = vpop.permute.xlu1 %456 }
 0x160   :  { %v506_v52 = vsel %vm338_vm2, %v457_v38, 0.0 }
 0x161   :  { %501 = vadd.xlane.f32.xlu1 %v500_v39 }
 0x163   :  { %v459_v40 = vpop.permute.xlu1 %458  ;;  %v1073_v41 = vpop.trf.xlu0 }
 0x164   :  { %v509_v55 = vsel %vm338_vm2, %v459_v40, 0.0 }
 0x167   :  { %v461_v42 = vpop.permute.xlu1 %460  ;;  %v1075_v43 = vpop.trf.xlu0 }
 0x168   :  { %v693_v28 = vpack.c.bf16 %v1075_v43, %v1073_v41  ;;  %v512_v59 = vsel %vm338_vm2, %v461_v42, 0.0 }
 0x16a   :  { %694 = vmatpush3.bf16.msra.mxu1 %v693_v28 }
 0x16b   :  { %v463_v44 = vpop.permute.xlu1 %462 }
 0x16c   :  { %v515_v57 = vsel %vm338_vm2, %v463_v44, 0.0 }
 0x16d   :  { %682 = vmatmul.mubr.msk.f32.vlgmr.msra.gmra.mrb[6].mxu1 %vm338_vm2, %v842_v11 }
 0x16f   :  { %v465_v45 = vpop.permute.xlu1 %464 }
 0x170   :  { %v518_v63 = vsel %vm338_vm2, %v465_v45, 0.0 }
 0x173   :  { %v467_v46 = vpop.permute.xlu1 %466 }
 0x174   :  { %v521_v62 = vsel %vm338_vm2, %v467_v46, 0.0 }
 0x177   :  { %v469_v47 = vpop.permute.xlu1 %468 }
 0x178   :  { %v524_v1 = vsel %vm338_vm2, %v469_v47, 0.0 }
 0x17b   :  { %v471_v48 = vpop.permute.xlu1 %470 }
 0x17c   :  { %v527_v0 = vsel %vm338_vm2, %v471_v48, 0.0 }
 0x17f   :  { %v473_v49 = vpop.permute.xlu1 %472 }
 0x180   :  { %v530_v50 = vsel %vm338_vm2, %v473_v49, 0.0 }
 0x181   :  { %531 = vadd.xlane.f32.xlu1 %v530_v50 }
 0x183   :  { %v475_v51 = vpop.permute.xlu1 %474 }
 0x184   :  { %v533_v53 = vsel %vm338_vm2, %v475_v51, 0.0 }
 0x185   :  { %507 = vadd.xlane.f32.xlu1 %v506_v52  ;;  %534 = vadd.xlane.f32.xlu0 %v533_v53 }
 0x187   :  { %v477_v54 = vpop.permute.xlu1 %476 }
 0x188   :  { %v536_v11 = vsel %vm338_vm2, %v477_v54, 0.0 }
 0x189   :  { %510 = vadd.xlane.f32.xlu0 %v509_v55  ;;  %537 = vadd.xlane.f32.xlu1 %v536_v11 }
 0x18b   :  { %v479_v56 = vpop.permute.xlu1 %478 }
 0x18c   :  { %v539_v58 = vsel %vm338_vm2, %v479_v56, 0.0 }
 0x18d   :  { %516 = vadd.xlane.f32.xlu1 %v515_v57  ;;  %540 = vadd.xlane.f32.xlu0 %v539_v58 }
 0x18f   :  { %v481_v60 = vpop.permute.xlu1 %480 }
 0x190   :  { %v542_v61 = vsel %vm338_vm2, %v481_v60, 0.0 }
 0x191   :  { %513 = vadd.xlane.f32.xlu1 %v512_v59 }
 0x195   :  { %543 = vadd.xlane.f32.xlu1 %v542_v61 }
 0x199   :  { %522 = vadd.xlane.f32.xlu1 %v521_v62 }
 0x19d   :  { %519 = vadd.xlane.f32.xlu1 %v518_v63 }
 0x1a1   :  { %528 = vadd.xlane.f32.xlu1 %v527_v0 }
 0x1a5   :  { %525 = vadd.xlane.f32.xlu1 %v524_v1 }
 0x1b6   :  { %326 = vperm.xlu1 %709, %v322_v2  }
 0x1ba   :  { %v483_v3 = vpop.permute.xlu0 %482 }
 0x1bb   :  { %v545_v4 = vsel %vm338_vm2, %v483_v3, 0.0 }
 0x1bc   :  { %546 = vadd.xlane.f32.xlu0 %v545_v4 }
 0x1d2   :  { %331 = vperm.xlu0 %710, %v323_v5  }
 0x1ea   :  { %v505_v6 = vpop.xlane.xlu1 %504 }
 0x1eb   :  { %550 = vst.msk [vmem:[%s1200_s9 + $0x8] sm:$0xff] %vm548_vm3, %v505_v6 }
 0x1ee   :  { %v502_v7 = vpop.xlane.xlu1 %501 }
 0x1ef   :  { %549 = vst.msk [vmem:[%s1200_s9] sm:$0xff] %vm548_vm3, %v502_v7 }
 0x20e   :  { %v532_v8 = vpop.xlane.xlu1 %531 }
 0x20f   :  { %559 = vst.msk [vmem:[%s1200_s9 + $0x50] sm:$0xff] %vm548_vm3, %v532_v8 }
 0x212   :  { %v535_v9 = vpop.xlane.xlu0 %534  ;;  %v508_v10 = vpop.xlane.xlu1 %507 }
 0x213   :  { %560 = vst.msk [vmem:[%s1200_s9 + $0x58] sm:$0xff] %vm548_vm3, %v535_v9  ;;  %551 = vst.msk [vmem:[%s1200_s9 + $0x10] sm:$0xff] %vm548_vm3, %v508_v10 }
 0x216   :  { %v511_v12 = vpop.xlane.xlu0 %510  ;;  %v538_v13 = vpop.xlane.xlu1 %537 }
 0x217   :  { %552 = vst.msk [vmem:[%s1200_s9 + $0x18] sm:$0xff] %vm548_vm3, %v511_v12  ;;  %561 = vst.msk [vmem:[%s1200_s9 + $0x60] sm:$0xff] %vm548_vm3, %v538_v13 }
 0x21a   :  { %v541_v14 = vpop.xlane.xlu0 %540  ;;  %v517_v15 = vpop.xlane.xlu1 %516 }
 0x21b   :  { %562 = vst.msk [vmem:[%s1200_s9 + $0x68] sm:$0xff] %vm548_vm3, %v541_v14  ;;  %554 = vst.msk [vmem:[%s1200_s9 + $0x28] sm:$0xff] %vm548_vm3, %v517_v15 }
 0x21e   :  { %v514_v16 = vpop.xlane.xlu1 %513 }
 0x21f   :  { %553 = vst.msk [vmem:[%s1200_s9 + $0x20] sm:$0xff] %vm548_vm3, %v514_v16 }
 0x222   :  { %v544_v17 = vpop.xlane.xlu1 %543 }
 0x223   :  { %563 = vst.msk [vmem:[%s1200_s9 + $0x70] sm:$0xff] %vm548_vm3, %v544_v17 }
 0x226   :  { %v523_v18 = vpop.xlane.xlu1 %522 }
 0x227   :  { %556 = vst.msk [vmem:[%s1200_s9 + $0x38] sm:$0xff] %vm548_vm3, %v523_v18 }
 0x22a   :  { %v520_v19 = vpop.xlane.xlu1 %519 }
 0x22b   :  { %555 = vst.msk [vmem:[%s1200_s9 + $0x30] sm:$0xff] %vm548_vm3, %v520_v19 }
 0x22e   :  { %v529_v20 = vpop.xlane.xlu1 %528 }
 0x22f   :  { %558 = vst.msk [vmem:[%s1200_s9 + $0x48] sm:$0xff] %vm548_vm3, %v529_v20 }
 0x232   :  { %v526_v21 = vpop.xlane.xlu1 %525 }
 0x233   :  { %557 = vst.msk [vmem:[%s1200_s9 + $0x40] sm:$0xff] %vm548_vm3, %v526_v21 }
 0x236   :  { %v327_v22 = vpop.permute.xlu1 %326 }
 0x237   :  { %v334_v23 = vmul.f32 %v327_v22, %v1073_v41 }
 0x239   :  { %336 = vst [vmem:[#allocation2] sm:$0xff] %v334_v23 }
 0x240   :  { %v408_v24 = vpop.f32.mrb[6].mxu1 }
 0x241   :  { %412 = vst [vmem:[#allocation4] sm:$0x1] %v408_v24  ;;  %v683_v25 = vpop.f32.mrb[7].mxu1 }
 0x242   :  { %722 = shalt.err (!%p719_p4)
}
 0x243   :  { %s723_s23 = scalar_lea.hbm %s1199_s8, 16 }
 0x244   :  { %p724_p5 = scmp.ne.s32.totalorder %s1199_s8, %s723_s23  ;;  %p727_p6 = scmp.lt.u32.totalorder %s723_s23, %s1199_s8 }
 0x246   :  { %p729_p7 = pnand %p727_p6, %p724_p5 }
 0x248   :  { %732 = shalt.err (!%p729_p7)
}
 0x249   :  { %588 = dma.vmem_to_hbm [thread:$0]  %s586_s20, 16, %s1199_s8, [#allocation5]   ;;  %v547_v26 = vpop.xlane.xlu0 %546 }
 0x24a   :  { %564 = vst.msk [vmem:[%s1200_s9 + $0x78] sm:$0xff] %vm548_vm3, %v547_v26  ;;  %s766_s0 = smov [#allocation2]  }
 0x24b   :  { %s572_s2 = sshll.u32 %s766_s0, 4  ;;  %s573_s2 = int_to_ptr.vmem [resolvable:$true] %s572_s2 }
 0x24c   :  { %s733_s4 = scalar_lea.vmem %s573_s2, 256  ;;  %p738_p9 = scmp.lt.s32.totalorder %s573_s2, %s573_s2 }
 0x24d   :  { %p734_p8 = scmp.ne.s32.totalorder %s573_s2, %s733_s4  ;;  %p739_p10 = scmp.lt.s32.totalorder %s733_s4, %s733_s4 }
 0x24f   :  { %p740_p11 = por %p739_p10, %p738_p9 }
 0x251   :  { %v332_v27 = vpop.permute.xlu0 %331  ;;  %p741_p12 = pnand %p740_p11, %p734_p8 }
 0x252   :  { %v335_v29 = vmul.f32 %v332_v27, %v1075_v43 }
 0x254   :  { %337 = vst [vmem:[#allocation2 + $0x8] sm:$0xff] %v335_v29 }
 0x255   :  { %744 = shalt.err (!%p741_p12)
}
 0x256   :  { %s745_s11 = scalar_lea.hbm %s1198_s7, 256 }
 0x257   :  { %p746_p13 = scmp.ne.s32.totalorder %s1198_s7, %s745_s11  ;;  %p749_p0 = scmp.lt.u32.totalorder %s745_s11, %s1198_s7 }
 0x259   :  { %p751_p1 = pnand %p749_p0, %p746_p13 }
 0x25b   :  { %754 = shalt.err (!%p751_p1)
}
 0x25c   :  { %s767_s13 = smov 128   ;;  %s768_s15 = smov 8  }
 0x25d   :  { %578 = dma.vmem_to_hbm [thread:$0]  %s573_s2, 256, %s1198_s7, [#allocation3], %s767_s13, %s767_s13, %s768_s15  }
 0x25e   :  { %755 = dma.done.wait [#allocation3], 256  }
 0x25f   :  { %756 = vsyncadd [#allocation3], 4294967040 }
 0x260   :  { %757 = dma.done.wait [#allocation5], 16  }
 0x261   :  { %758 = vsyncadd [#allocation5], 4294967280 }
 0x262   :  { %601 = vsyncpa [#allocation3], 1 }
 0x263   :  { %602 = vsyncpa [#allocation5], 1 }

</bundles_post_ra>
